<compile_context>
chip_gen: v5e
topology: v5e:2x2
jax: 0.10.0
libtpu: 0.0.40
codegen_flags: <defaults>
</compile_context>

<pallas_src>
import functools
import math

import jax
import jax.numpy as jnp
from jax.experimental import pallas as pl
from jax.experimental.pallas import tpu as pltpu

KSIZE = 7
PAD = (KSIZE - 1) // 2
BN_EPS = 1e-5


def spatial_gate_kernel(x_ref, w_ref, bn_ref, o_ref, *, orig_w):
    # x_ref : VMEM (C, TH, Wp)   current (batch, row-tile) block; Wp = g * orig_w
    # w_ref : SMEM (14,) f32     conv weights: [7 taps for max-plane, 7 taps for mean-plane]
    # bn_ref: SMEM (2,)  f32     folded BN affine: [scale, bias]
    # o_ref : VMEM (C, TH, Wp)
    C, TH, Wp = x_ref.shape

    # --- ChannelPool: fused max + sum over channels (single pass over C) ---
    plane0 = x_ref[0].astype(jnp.float32)

    def red_body(c, carry):
        cmax, csum = carry
        p = x_ref[c].astype(jnp.float32)
        return jnp.maximum(cmax, p), csum + p

    cmax, csum = jax.lax.fori_loop(
        1, C, red_body, (plane0, plane0), unroll=max(1, min(C - 1, 8)))
    cmean = csum * (1.0 / C)

    # --- Conv2d(2 -> 1, kernel (1,7), padding (0,3), no bias) along original W ---
    # colw = original column index inside the packed lane axis.
    col = jax.lax.broadcasted_iota(jnp.int32, (TH, Wp), 1)
    colw = col % orig_w
    acc = jnp.zeros((TH, Wp), jnp.float32)
    for kw in range(KSIZE):
        shift = kw - PAD                          # tap offset in [-3, 3]
        amt = (-shift) % Wp                       # non-negative cyclic roll amount
        if amt == 0:
            r_max, r_mean = cmax, cmean
        else:
            # rolled[w] = plane[(w + shift) % Wp]  (jnp.roll semantics)
            r_max = pltpu.roll(cmax, shift=amt, axis=1)
            r_mean = pltpu.roll(cmean, shift=amt, axis=1)
        tap = w_ref[kw] * r_max + w_ref[KSIZE + kw] * r_mean
        if shift < 0:
            tap = jnp.where(colw >= -shift, tap, 0.0)
        elif shift > 0:
            tap = jnp.where(colw < orig_w - shift, tap, 0.0)
        acc = acc + tap

    # --- BatchNorm2d(1), eval mode (folded to scale/bias) + sigmoid gate ---
    gate = jax.nn.sigmoid(acc * bn_ref[0] + bn_ref[1])        # (TH, Wp) f32

    # --- gate the input, broadcast over channels ---
    def gate_body(c, _):
        o_ref[c] = (x_ref[c].astype(jnp.float32) * gate).astype(o_ref.dtype)
        return 0

    jax.lax.fori_loop(0, C, gate_body, 0, unroll=max(1, min(C, 8)))


def _pick_lane_packing(H, W):
    """Pick g (dividing H) so the packed lane axis g*W is a multiple of 128 if possible."""
    if W % 128 == 0:
        return 1
    exact = [g for g in range(1, H + 1)
             if H % g == 0 and (g * W) % 128 == 0 and g * W <= 4096]
    if exact:
        return exact[0]
    dense = [g for g in range(1, H + 1) if H % g == 0 and g * W <= 512]
    return dense[-1] if dense else 1


def _pick_row_tile(C, Hr, Wp, itemsize, budget_bytes=4 * 1024 * 1024):
    """Rows per grid step: divides Hr, multiple of the sublane count (or == Hr),
    and keeps one (C, TH, Wp) block under the per-block budget."""
    sub = 8 if itemsize >= 4 else 16
    max_rows = max(1, budget_bytes // max(1, C * Wp * itemsize))
    if Hr <= max_rows:
        return Hr
    best = None
    for d in range(sub, Hr + 1, sub):
        if Hr % d == 0 and d <= max_rows:
            best = d
    return best if best is not None else Hr


def spatial_gate(x, conv_w, gamma, beta, run_mean, run_var):
    """x: (N, C, H, W); conv_w: (1, 2, 1, 7); BN params: scalars (eval-mode running stats)."""
    N, C, H, W = x.shape
    g = _pick_lane_packing(H, W)
    Hr, Wp = H // g, g * W
    xr = x.reshape(N, C, Hr, Wp)                       # contiguous reshape -> lane-dense last axis
    TH = _pick_row_tile(C, Hr, Wp, jnp.dtype(x.dtype).itemsize)

    # Flat scalar tables (avoid padded 2-D SMEM slabs).
    w_flat = conv_w.reshape(2 * KSIZE).astype(jnp.float32)        # [max taps ; mean taps]
    bn_scale = gamma.astype(jnp.float32) * jax.lax.rsqrt(run_var.astype(jnp.float32) + BN_EPS)
    bn_bias = beta.astype(jnp.float32) - run_mean.astype(jnp.float32) * bn_scale
    bn = jnp.stack([bn_scale, bn_bias])

    kernel = functools.partial(spatial_gate_kernel, orig_w=W)
    out = pl.pallas_call(
        kernel,
        out_shape=jax.ShapeDtypeStruct((N, C, Hr, Wp), x.dtype),
        grid_spec=pltpu.PrefetchScalarGridSpec(
            num_scalar_prefetch=0,
            grid=(N, Hr // TH),
            in_specs=[
                pl.BlockSpec((None, C, TH, Wp), lambda n, h: (n, 0, h, 0)),
                pl.BlockSpec(memory_space=pltpu.MemorySpace.SMEM),
                pl.BlockSpec(memory_space=pltpu.MemorySpace.SMEM),
            ],
            out_specs=pl.BlockSpec((None, C, TH, Wp), lambda n, h: (n, 0, h, 0)),
        ),
        compiler_params=pltpu.CompilerParams(
            dimension_semantics=("parallel", "parallel"),
            vmem_limit_bytes=32 * 1024 * 1024,
        ),
    )(xr, w_flat, bn)
    return out.reshape(N, C, H, W)


def reference(x, conv_w, gamma, beta, rmean, rvar):
    cmax = jnp.max(x, axis=1, keepdims=True)
    cmean = jnp.mean(x, axis=1, keepdims=True)
    xc = jnp.concatenate([cmax, cmean], axis=1)                    # (N, 2, H, W)
    out = jax.lax.conv_general_dilated(
        xc, conv_w, window_strides=(1, 1),
        padding=((0, 0), (PAD, PAD)),
        dimension_numbers=("NCHW", "OIHW", "NCHW"))                # (N, 1, H, W)
    bn = (out - rmean) / jnp.sqrt(rvar + BN_EPS) * gamma + beta
    return x * jax.nn.sigmoid(bn)


if __name__ == "__main__":
    key = jax.random.PRNGKey(0)
    kx, kw, kg, kb, km, kv = jax.random.split(key, 6)

    N, C, H, W = 2, 4, 16, 16
    x = jax.random.normal(kx, (N, C, H, W), dtype=jnp.float32)

    # Deterministic synthetic parameters (shapes match nn.Conv2d(2,1,(1,7),bias=False)
    # and nn.BatchNorm2d(1)).
    conv_w = 0.5 * jax.random.normal(kw, (1, 2, 1, KSIZE), dtype=jnp.float32)
    gamma = jax.random.uniform(kg, (), minval=0.5, maxval=1.5, dtype=jnp.float32)
    beta = 0.1 * jax.random.normal(kb, (), dtype=jnp.float32)
    run_mean = 0.1 * jax.random.normal(km, (), dtype=jnp.float32)
    run_var = jax.random.uniform(kv, (), minval=0.5, maxval=1.5, dtype=jnp.float32)

    out = spatial_gate(x, conv_w, gamma, beta, run_mean, run_var)
    out = jax.block_until_ready(out)

    ref = reference(x, conv_w, gamma, beta, run_mean, run_var)
    assert out.shape == x.shape
    assert jnp.allclose(out, ref, atol=1e-5, rtol=1e-5), "mismatch vs JAX reference"

    print("KERNEL_OK")
</pallas_src>

<mosaic_0001>
module attributes {stable_mosaic.version = 11 : i64} {
  func.func @spatial_gate_kernel(%arg0: i32, %arg1: i32, %arg2: memref<1x4x2x128xf32, #tpu.memory_space<vmem>>, %arg3: memref<14xf32, #tpu.memory_space<smem>>, %arg4: memref<2xf32, #tpu.memory_space<smem>>, %arg5: memref<1x4x2x128xf32, #tpu.memory_space<vmem>>) attributes {dimension_semantics = [#tpu.dimension_semantics<parallel>, #tpu.dimension_semantics<parallel>], iteration_bounds = array<i64: 2, 1>, scalar_prefetch = 0 : i64, scratch_operands = 0 : i64, tpu.core_type = #tpu.core_type<tc>, window_params = [{transform_indices = @transform_0, window_bounds = array<i64: 1, 4, 2, 128>}, {transform_indices = @transform_1, window_bounds = array<i64: 14>}, {transform_indices = @transform_2, window_bounds = array<i64: 2>}, {transform_indices = @transform_3, window_bounds = array<i64: 1, 4, 2, 128>}]} {
    %c0 = arith.constant 0 : index
    %c0_0 = arith.constant 0 : index
    %c0_1 = arith.constant 0 : index
    %c0_2 = arith.constant 0 : index
    %0 = vector.load %arg2[%c0, %c0_0, %c0_1, %c0_2] : memref<1x4x2x128xf32, #tpu.memory_space<vmem>>, vector<1x1x2x128xf32>
    %1 = vector.shape_cast %0 : vector<1x1x2x128xf32> to vector<2x128xf32>
    %c1_i32 = arith.constant 1 : i32
    %c0_3 = arith.constant 0 : index
    %2 = arith.index_cast %c1_i32 : i32 to index
    %c0_4 = arith.constant 0 : index
    %c0_5 = arith.constant 0 : index
    %3 = vector.load %arg2[%c0_3, %2, %c0_4, %c0_5] : memref<1x4x2x128xf32, #tpu.memory_space<vmem>>, vector<1x1x2x128xf32>
    %4 = vector.shape_cast %3 : vector<1x1x2x128xf32> to vector<2x128xf32>
    %5 = arith.maximumf %1, %4 : vector<2x128xf32>
    %6 = arith.addf %1, %4 : vector<2x128xf32>
    %c2_i32 = arith.constant 2 : i32
    %c0_6 = arith.constant 0 : index
    %7 = arith.index_cast %c2_i32 : i32 to index
    %c0_7 = arith.constant 0 : index
    %c0_8 = arith.constant 0 : index
    %8 = vector.load %arg2[%c0_6, %7, %c0_7, %c0_8] : memref<1x4x2x128xf32, #tpu.memory_space<vmem>>, vector<1x1x2x128xf32>
    %9 = vector.shape_cast %8 : vector<1x1x2x128xf32> to vector<2x128xf32>
    %10 = arith.maximumf %5, %9 : vector<2x128xf32>
    %11 = arith.addf %6, %9 : vector<2x128xf32>
    %c3_i32 = arith.constant 3 : i32
    %c0_9 = arith.constant 0 : index
    %12 = arith.index_cast %c3_i32 : i32 to index
    %c0_10 = arith.constant 0 : index
    %c0_11 = arith.constant 0 : index
    %13 = vector.load %arg2[%c0_9, %12, %c0_10, %c0_11] : memref<1x4x2x128xf32, #tpu.memory_space<vmem>>, vector<1x1x2x128xf32>
    %14 = vector.shape_cast %13 : vector<1x1x2x128xf32> to vector<2x128xf32>
    %15 = arith.maximumf %10, %14 : vector<2x128xf32>
    %16 = arith.addf %11, %14 : vector<2x128xf32>
    %c3_i32_12 = arith.constant 3 : i32
    %cst = arith.constant 2.500000e-01 : f32
    %17 = vector.broadcast %cst : f32 to vector<2x128xf32>
    %18 = arith.mulf %16, %17 : vector<2x128xf32>
    %19 = tpu.iota {dimensions = array<i32: 1>} : vector<2x128xi32>
    %c16_i32 = arith.constant 16 : i32
    %c0_i32 = arith.constant 0 : i32
    %20 = arith.cmpi eq, %c16_i32, %c0_i32 : i32
    %c1_i32_13 = arith.constant 1 : i32
    %21 = arith.select %20, %c1_i32_13, %c16_i32 : i32
    %22 = vector.broadcast %21 : i32 to vector<2x128xi32>
    %23 = arith.remsi %19, %22 : vector<2x128xi32>
    %c0_i32_14 = arith.constant 0 : i32
    %24 = vector.broadcast %c0_i32_14 : i32 to vector<2x128xi32>
    %25 = arith.cmpi ne, %23, %24 : vector<2x128xi32>
    %c0_i32_15 = arith.constant 0 : i32
    %26 = vector.broadcast %c0_i32_15 : i32 to vector<2x128xi32>
    %27 = arith.cmpi slt, %23, %26 : vector<2x128xi32>
    %c0_i32_16 = arith.constant 0 : i32
    %28 = arith.cmpi slt, %21, %c0_i32_16 : i32
    %29 = vector.broadcast %28 : i1 to vector<2x128xi1>
    %30 = vector.broadcast %29 : vector<2x128xi1> to vector<2x128xi1>
    %31 = arith.xori %27, %30 : vector<2x128xi1>
    %32 = arith.andi %31, %25 : vector<2x128xi1>
    %33 = vector.broadcast %21 : i32 to vector<2x128xi32>
    %34 = arith.addi %23, %33 : vector<2x128xi32>
    %35 = arith.select %32, %34, %23 : vector<2x128xi1>, vector<2x128xi32>
    %cst_17 = arith.constant 0.000000e+00 : f32
    %36 = vector.broadcast %cst_17 : f32 to vector<2x128xf32>
    %c3_i32_18 = arith.constant 3 : i32
    %37 = tpu.dynamic_rotate %15 by %c3_i32_18 dim 1 : vector<2x128xf32>, i32 -> vector<2x128xf32>
    %c3_i32_19 = arith.constant 3 : i32
    %38 = tpu.dynamic_rotate %18 by %c3_i32_19 dim 1 : vector<2x128xf32>, i32 -> vector<2x128xf32>
    %c0_20 = arith.constant 0 : index
    %39 = memref.load %arg3[%c0_20] : memref<14xf32, #tpu.memory_space<smem>>
    %40 = vector.broadcast %39 : f32 to vector<2x128xf32>
    %41 = arith.mulf %40, %37 : vector<2x128xf32>
    %c7 = arith.constant 7 : index
    %42 = memref.load %arg3[%c7] : memref<14xf32, #tpu.memory_space<smem>>
    %43 = vector.broadcast %42 : f32 to vector<2x128xf32>
    %44 = arith.mulf %43, %38 : vector<2x128xf32>
    %45 = arith.addf %41, %44 : vector<2x128xf32>
    %c3_i32_21 = arith.constant 3 : i32
    %46 = vector.broadcast %c3_i32_21 : i32 to vector<2x128xi32>
    %47 = arith.cmpi sge, %35, %46 : vector<2x128xi32>
    %cst_22 = arith.constant 0.000000e+00 : f32
    %48 = vector.broadcast %cst_22 : f32 to vector<2x128xf32>
    %49 = arith.select %47, %45, %48 : vector<2x128xi1>, vector<2x128xf32>
    %50 = arith.addf %36, %49 : vector<2x128xf32>
    %c2_i32_23 = arith.constant 2 : i32
    %51 = tpu.dynamic_rotate %15 by %c2_i32_23 dim 1 : vector<2x128xf32>, i32 -> vector<2x128xf32>
    %c2_i32_24 = arith.constant 2 : i32
    %52 = tpu.dynamic_rotate %18 by %c2_i32_24 dim 1 : vector<2x128xf32>, i32 -> vector<2x128xf32>
    %c1 = arith.constant 1 : index
    %53 = memref.load %arg3[%c1] : memref<14xf32, #tpu.memory_space<smem>>
    %54 = vector.broadcast %53 : f32 to vector<2x128xf32>
    %55 = arith.mulf %54, %51 : vector<2x128xf32>
    %c8 = arith.constant 8 : index
    %56 = memref.load %arg3[%c8] : memref<14xf32, #tpu.memory_space<smem>>
    %57 = vector.broadcast %56 : f32 to vector<2x128xf32>
    %58 = arith.mulf %57, %52 : vector<2x128xf32>
    %59 = arith.addf %55, %58 : vector<2x128xf32>
    %c2_i32_25 = arith.constant 2 : i32
    %60 = vector.broadcast %c2_i32_25 : i32 to vector<2x128xi32>
    %61 = arith.cmpi sge, %35, %60 : vector<2x128xi32>
    %cst_26 = arith.constant 0.000000e+00 : f32
    %62 = vector.broadcast %cst_26 : f32 to vector<2x128xf32>
    %63 = arith.select %61, %59, %62 : vector<2x128xi1>, vector<2x128xf32>
    %64 = arith.addf %50, %63 : vector<2x128xf32>
    %c1_i32_27 = arith.constant 1 : i32
    %65 = tpu.dynamic_rotate %15 by %c1_i32_27 dim 1 : vector<2x128xf32>, i32 -> vector<2x128xf32>
    %c1_i32_28 = arith.constant 1 : i32
    %66 = tpu.dynamic_rotate %18 by %c1_i32_28 dim 1 : vector<2x128xf32>, i32 -> vector<2x128xf32>
    %c2 = arith.constant 2 : index
    %67 = memref.load %arg3[%c2] : memref<14xf32, #tpu.memory_space<smem>>
    %68 = vector.broadcast %67 : f32 to vector<2x128xf32>
    %69 = arith.mulf %68, %65 : vector<2x128xf32>
    %c9 = arith.constant 9 : index
    %70 = memref.load %arg3[%c9] : memref<14xf32, #tpu.memory_space<smem>>
    %71 = vector.broadcast %70 : f32 to vector<2x128xf32>
    %72 = arith.mulf %71, %66 : vector<2x128xf32>
    %73 = arith.addf %69, %72 : vector<2x128xf32>
    %c1_i32_29 = arith.constant 1 : i32
    %74 = vector.broadcast %c1_i32_29 : i32 to vector<2x128xi32>
    %75 = arith.cmpi sge, %35, %74 : vector<2x128xi32>
    %cst_30 = arith.constant 0.000000e+00 : f32
    %76 = vector.broadcast %cst_30 : f32 to vector<2x128xf32>
    %77 = arith.select %75, %73, %76 : vector<2x128xi1>, vector<2x128xf32>
    %78 = arith.addf %64, %77 : vector<2x128xf32>
    %c3 = arith.constant 3 : index
    %79 = memref.load %arg3[%c3] : memref<14xf32, #tpu.memory_space<smem>>
    %80 = vector.broadcast %79 : f32 to vector<2x128xf32>
    %81 = arith.mulf %80, %15 : vector<2x128xf32>
    %c10 = arith.constant 10 : index
    %82 = memref.load %arg3[%c10] : memref<14xf32, #tpu.memory_space<smem>>
    %83 = vector.broadcast %82 : f32 to vector<2x128xf32>
    %84 = arith.mulf %83, %18 : vector<2x128xf32>
    %85 = arith.addf %81, %84 : vector<2x128xf32>
    %86 = arith.addf %78, %85 : vector<2x128xf32>
    %c127_i32 = arith.constant 127 : i32
    %87 = tpu.dynamic_rotate %15 by %c127_i32 dim 1 : vector<2x128xf32>, i32 -> vector<2x128xf32>
    %c127_i32_31 = arith.constant 127 : i32
    %88 = tpu.dynamic_rotate %18 by %c127_i32_31 dim 1 : vector<2x128xf32>, i32 -> vector<2x128xf32>
    %c4 = arith.constant 4 : index
    %89 = memref.load %arg3[%c4] : memref<14xf32, #tpu.memory_space<smem>>
    %90 = vector.broadcast %89 : f32 to vector<2x128xf32>
    %91 = arith.mulf %90, %87 : vector<2x128xf32>
    %c11 = arith.constant 11 : index
    %92 = memref.load %arg3[%c11] : memref<14xf32, #tpu.memory_space<smem>>
    %93 = vector.broadcast %92 : f32 to vector<2x128xf32>
    %94 = arith.mulf %93, %88 : vector<2x128xf32>
    %95 = arith.addf %91, %94 : vector<2x128xf32>
    %c15_i32 = arith.constant 15 : i32
    %96 = vector.broadcast %c15_i32 : i32 to vector<2x128xi32>
    %97 = arith.cmpi slt, %35, %96 : vector<2x128xi32>
    %cst_32 = arith.constant 0.000000e+00 : f32
    %98 = vector.broadcast %cst_32 : f32 to vector<2x128xf32>
    %99 = arith.select %97, %95, %98 : vector<2x128xi1>, vector<2x128xf32>
    %100 = arith.addf %86, %99 : vector<2x128xf32>
    %c126_i32 = arith.constant 126 : i32
    %101 = tpu.dynamic_rotate %15 by %c126_i32 dim 1 : vector<2x128xf32>, i32 -> vector<2x128xf32>
    %c126_i32_33 = arith.constant 126 : i32
    %102 = tpu.dynamic_rotate %18 by %c126_i32_33 dim 1 : vector<2x128xf32>, i32 -> vector<2x128xf32>
    %c5 = arith.constant 5 : index
    %103 = memref.load %arg3[%c5] : memref<14xf32, #tpu.memory_space<smem>>
    %104 = vector.broadcast %103 : f32 to vector<2x128xf32>
    %105 = arith.mulf %104, %101 : vector<2x128xf32>
    %c12 = arith.constant 12 : index
    %106 = memref.load %arg3[%c12] : memref<14xf32, #tpu.memory_space<smem>>
    %107 = vector.broadcast %106 : f32 to vector<2x128xf32>
    %108 = arith.mulf %107, %102 : vector<2x128xf32>
    %109 = arith.addf %105, %108 : vector<2x128xf32>
    %c14_i32 = arith.constant 14 : i32
    %110 = vector.broadcast %c14_i32 : i32 to vector<2x128xi32>
    %111 = arith.cmpi slt, %35, %110 : vector<2x128xi32>
    %cst_34 = arith.constant 0.000000e+00 : f32
    %112 = vector.broadcast %cst_34 : f32 to vector<2x128xf32>
    %113 = arith.select %111, %109, %112 : vector<2x128xi1>, vector<2x128xf32>
    %114 = arith.addf %100, %113 : vector<2x128xf32>
    %c125_i32 = arith.constant 125 : i32
    %115 = tpu.dynamic_rotate %15 by %c125_i32 dim 1 : vector<2x128xf32>, i32 -> vector<2x128xf32>
    %c125_i32_35 = arith.constant 125 : i32
    %116 = tpu.dynamic_rotate %18 by %c125_i32_35 dim 1 : vector<2x128xf32>, i32 -> vector<2x128xf32>
    %c6 = arith.constant 6 : index
    %117 = memref.load %arg3[%c6] : memref<14xf32, #tpu.memory_space<smem>>
    %118 = vector.broadcast %117 : f32 to vector<2x128xf32>
    %119 = arith.mulf %118, %115 : vector<2x128xf32>
    %c13 = arith.constant 13 : index
    %120 = memref.load %arg3[%c13] : memref<14xf32, #tpu.memory_space<smem>>
    %121 = vector.broadcast %120 : f32 to vector<2x128xf32>
    %122 = arith.mulf %121, %116 : vector<2x128xf32>
    %123 = arith.addf %119, %122 : vector<2x128xf32>
    %c13_i32 = arith.constant 13 : i32
    %124 = vector.broadcast %c13_i32 : i32 to vector<2x128xi32>
    %125 = arith.cmpi slt, %35, %124 : vector<2x128xi32>
    %cst_36 = arith.constant 0.000000e+00 : f32
    %126 = vector.broadcast %cst_36 : f32 to vector<2x128xf32>
    %127 = arith.select %125, %123, %126 : vector<2x128xi1>, vector<2x128xf32>
    %128 = arith.addf %114, %127 : vector<2x128xf32>
    %c0_37 = arith.constant 0 : index
    %129 = memref.load %arg4[%c0_37] : memref<2xf32, #tpu.memory_space<smem>>
    %130 = vector.broadcast %129 : f32 to vector<2x128xf32>
    %131 = arith.mulf %128, %130 : vector<2x128xf32>
    %c1_38 = arith.constant 1 : index
    %132 = memref.load %arg4[%c1_38] : memref<2xf32, #tpu.memory_space<smem>>
    %133 = vector.broadcast %132 : f32 to vector<2x128xf32>
    %134 = arith.addf %131, %133 : vector<2x128xf32>
    %135 = arith.negf %134 : vector<2x128xf32>
    %136 = math.exp %135 : vector<2x128xf32>
    %cst_39 = arith.constant 1.000000e+00 : f32
    %137 = vector.broadcast %cst_39 : f32 to vector<2x128xf32>
    %138 = arith.addf %137, %136 : vector<2x128xf32>
    %139 = arith.divf %137, %138 : vector<2x128xf32>
    %c0_i32_40 = arith.constant 0 : i32
    %c0_41 = arith.constant 0 : index
    %140 = arith.index_cast %c0_i32_40 : i32 to index
    %c0_42 = arith.constant 0 : index
    %c0_43 = arith.constant 0 : index
    %141 = vector.load %arg2[%c0_41, %140, %c0_42, %c0_43] : memref<1x4x2x128xf32, #tpu.memory_space<vmem>>, vector<1x1x2x128xf32>
    %142 = vector.shape_cast %141 : vector<1x1x2x128xf32> to vector<2x128xf32>
    %143 = arith.mulf %142, %139 : vector<2x128xf32>
    %c0_44 = arith.constant 0 : index
    %144 = arith.index_cast %c0_i32_40 : i32 to index
    %c0_45 = arith.constant 0 : index
    %c0_46 = arith.constant 0 : index
    %145 = vector.load %arg5[%c0_44, %144, %c0_45, %c0_46] : memref<1x4x2x128xf32, #tpu.memory_space<vmem>>, vector<1x1x2x128xf32>
    %146 = vector.shape_cast %145 : vector<1x1x2x128xf32> to vector<2x128xf32>
    %147 = vector.shape_cast %143 : vector<2x128xf32> to vector<1x1x2x128xf32>
    tpu.vector_store %arg5[%c0_44, %144, %c0_45, %c0_46], %147 {strides = array<i32>} : memref<1x4x2x128xf32, #tpu.memory_space<vmem>>, vector<1x1x2x128xf32>,
    %c1_i32_47 = arith.constant 1 : i32
    %c0_48 = arith.constant 0 : index
    %148 = arith.index_cast %c1_i32_47 : i32 to index
    %c0_49 = arith.constant 0 : index
    %c0_50 = arith.constant 0 : index
    %149 = vector.load %arg2[%c0_48, %148, %c0_49, %c0_50] : memref<1x4x2x128xf32, #tpu.memory_space<vmem>>, vector<1x1x2x128xf32>
    %150 = vector.shape_cast %149 : vector<1x1x2x128xf32> to vector<2x128xf32>
    %151 = arith.mulf %150, %139 : vector<2x128xf32>
    %c0_51 = arith.constant 0 : index
    %152 = arith.index_cast %c1_i32_47 : i32 to index
    %c0_52 = arith.constant 0 : index
    %c0_53 = arith.constant 0 : index
    %153 = vector.load %arg5[%c0_51, %152, %c0_52, %c0_53] : memref<1x4x2x128xf32, #tpu.memory_space<vmem>>, vector<1x1x2x128xf32>
    %154 = vector.shape_cast %153 : vector<1x1x2x128xf32> to vector<2x128xf32>
    %155 = vector.shape_cast %151 : vector<2x128xf32> to vector<1x1x2x128xf32>
    tpu.vector_store %arg5[%c0_51, %152, %c0_52, %c0_53], %155 {strides = array<i32>} : memref<1x4x2x128xf32, #tpu.memory_space<vmem>>, vector<1x1x2x128xf32>,
    %c2_i32_54 = arith.constant 2 : i32
    %c0_55 = arith.constant 0 : index
    %156 = arith.index_cast %c2_i32_54 : i32 to index
    %c0_56 = arith.constant 0 : index
    %c0_57 = arith.constant 0 : index
    %157 = vector.load %arg2[%c0_55, %156, %c0_56, %c0_57] : memref<1x4x2x128xf32, #tpu.memory_space<vmem>>, vector<1x1x2x128xf32>
    %158 = vector.shape_cast %157 : vector<1x1x2x128xf32> to vector<2x128xf32>
    %159 = arith.mulf %158, %139 : vector<2x128xf32>
    %c0_58 = arith.constant 0 : index
    %160 = arith.index_cast %c2_i32_54 : i32 to index
    %c0_59 = arith.constant 0 : index
    %c0_60 = arith.constant 0 : index
    %161 = vector.load %arg5[%c0_58, %160, %c0_59, %c0_60] : memref<1x4x2x128xf32, #tpu.memory_space<vmem>>, vector<1x1x2x128xf32>
    %162 = vector.shape_cast %161 : vector<1x1x2x128xf32> to vector<2x128xf32>
    %163 = vector.shape_cast %159 : vector<2x128xf32> to vector<1x1x2x128xf32>
    tpu.vector_store %arg5[%c0_58, %160, %c0_59, %c0_60], %163 {strides = array<i32>} : memref<1x4x2x128xf32, #tpu.memory_space<vmem>>, vector<1x1x2x128xf32>,
    %c3_i32_61 = arith.constant 3 : i32
    %c0_62 = arith.constant 0 : index
    %164 = arith.index_cast %c3_i32_61 : i32 to index
    %c0_63 = arith.constant 0 : index
    %c0_64 = arith.constant 0 : index
    %165 = vector.load %arg2[%c0_62, %164, %c0_63, %c0_64] : memref<1x4x2x128xf32, #tpu.memory_space<vmem>>, vector<1x1x2x128xf32>
    %166 = vector.shape_cast %165 : vector<1x1x2x128xf32> to vector<2x128xf32>
    %167 = arith.mulf %166, %139 : vector<2x128xf32>
    %c0_65 = arith.constant 0 : index
    %168 = arith.index_cast %c3_i32_61 : i32 to index
    %c0_66 = arith.constant 0 : index
    %c0_67 = arith.constant 0 : index
    %169 = vector.load %arg5[%c0_65, %168, %c0_66, %c0_67] : memref<1x4x2x128xf32, #tpu.memory_space<vmem>>, vector<1x1x2x128xf32>
    %170 = vector.shape_cast %169 : vector<1x1x2x128xf32> to vector<2x128xf32>
    %171 = vector.shape_cast %167 : vector<2x128xf32> to vector<1x1x2x128xf32>
    tpu.vector_store %arg5[%c0_65, %168, %c0_66, %c0_67], %171 {strides = array<i32>} : memref<1x4x2x128xf32, #tpu.memory_space<vmem>>, vector<1x1x2x128xf32>,
    %c4_i32 = arith.constant 4 : i32
    return
  }
  func.func @transform_0(%arg0: i32, %arg1: i32) -> (i32, i32, i32, i32) {
    %c0_i32 = arith.constant 0 : i32
    %c0_i32_0 = arith.constant 0 : i32
    %c0_i32_1 = arith.constant 0 : i32
    return %arg0, %c0_i32, %arg1, %c0_i32_0 : i32, i32, i32, i32
  }
  func.func @transform_1(%arg0: i32, %arg1: i32) -> i32 {
    %c0_i32 = arith.constant 0 : i32
    %c0_i32_0 = arith.constant 0 : i32
    return %c0_i32 : i32
  }
  func.func @transform_2(%arg0: i32, %arg1: i32) -> i32 {
    %c0_i32 = arith.constant 0 : i32
    %c0_i32_0 = arith.constant 0 : i32
    return %c0_i32 : i32
  }
  func.func @transform_3(%arg0: i32, %arg1: i32) -> (i32, i32, i32, i32) {
    %c0_i32 = arith.constant 0 : i32
    %c0_i32_0 = arith.constant 0 : i32
    %c0_i32_1 = arith.constant 0 : i32
    return %arg0, %c0_i32, %arg1, %c0_i32_0 : i32, i32, i32, i32
  }
}

</mosaic_0001>

<bundles_post_ra>
// kernel: tpu_custom_call.1
= control target key start
LH: loop header
LB: loop body
LE: loop exit
PB: predicated region body
PF: predicated region fallthrough
CT: control target
= control target key end

     0   :  { %s1053_s0 = inlined_call_operand.hbm [shape: f32[2,4,2,128], index: 0, kind: input, shape index: {}]   ;;  %s1054_s1 = inlined_call_operand.hbm [shape: f32[14], index: 1, kind: input, shape index: {}]   ;;  %s1055_s2 = inlined_call_operand.vmem [shape: f32[2], index: 2, kind: input, shape index: {}]   ;;  %s1056_s3 = inlined_call_operand.hbm [shape: f32[2,4,2,128], index: 3, kind: output, shape index: {}]  }
   0x1   :  { %1057 = sst [smem:[#allocation14_spill]] %s1054_s1 }
   0x2   :  { %8 = vsyncpa [#allocation3], 0 }
   0x3   :  { %10 = vsyncpa [#allocation3 + $0x1], 0 }
   0x4   :  { %11 = vsyncpa [#allocation5], 0 }
   0x5   :  { %12 = vsyncpa [#allocation6], 0 }
   0x6   :  { %13 = vsyncpa [#allocation4], 0 }
   0x7   :  { %15 = vsyncpa [#allocation4 + $0x1], 0  ;;  %s844_s12 = smov 0   ;;  %s846_s13 = smov 0  }
   0x8   :  { %s848_s14 = smov 0   ;;  %s850_s15 = smov 0  }
   0x9   :  { %s852_s16 = smov 0   ;;  %s854_s17 = smov 0  }
   0xa LB: > { %s520_s18 = sadd.s32 4294967295, %s811_s17   ;;  %s521_s19 = sadd.s32 4294967294, %s811_s17   ;;  %s811_s17 = sphi %s854_s17, %s21_s17   ;;  %s807_s16 = sphi %s852_s16, %s1070_s16   ;;  %s803_s15 = sphi %s850_s15, %s1069_s15   ;;  %s799_s14 = sphi %s848_s14, %s1068_s14   ;;  %s795_s13 = sphi %s846_s13, %s1067_s13   ;;  %s791_s12 = sphi %s844_s12, %s1066_s12  }
   0xb   : > { %s42_s20 = sadd.s32 1, %s799_s14  ;;  %p49_p0 = scmp.ne.s32.totalorder %s799_s14, %s795_s13 }
   0xc   : > { %p50_p1 = scmp.eq.s32.totalorder %s811_s17, 0  ;;  %p55_p2 = scmp.ne.s32.totalorder %s795_s13, %s791_s12 }
   0xd   : > { %p882_p3 = scmp.eq.s32.totalorder %s520_s18, 0  ;;  %p123_p4 = scmp.eq.s32.totalorder %s520_s18, 1 }
   0xe   : > { %p886_p5 = por %p50_p1, %p49_p0  ;;  %p129_p6 = scmp.eq.s32.totalorder %s521_s19, 1 }
   0xf   : > { %p892_p7 = por %p882_p3, %p55_p2  ;;  %p896_p8 = por %p123_p4, %p49_p0 }
  0x10   : > { %p900_p9 = por %p129_p6, %p55_p2  ;;  %p522_p10 = scmp.ge.s32.totalorder %s811_s17, 1 }
  0x11   : > { %p136_p11 = scmp.lt.s32.totalorder %s811_s17, 3  ;;  %s1063_s1 = sld [smem:[#allocation14_spill]] }
  0x12   : > { %p525_p13 = scmp.ge.s32.totalorder %s811_s17, 2  ;;  %p594_p0 = scmp.lt.s32.totalorder %s811_s17, 2 }
  0x13   : > { %p909_p12 = pnand %p522_p10, %p136_p11  ;;  %s158_s5 = sshll.u32 %s1055_s2, 4  ;;  %s159_s5 = int_to_ptr.vmem [resolvable:$true] %s158_s5 }
  0x14   : > { %p922_p2 = pnand %p594_p0, %p886_p5  ;;  %s813_s7 = smov [#allocation7]  }
  0x15   : > { %p577_p1 = pneg %p909_p12  ;;  %s814_s8 = smov [#allocation8]  }
  0x16   : > { %s33_s9 = sadd.s32 1, %s807_s16  ;;  %s169_s10 = sand.u32 1, %s799_s14  }
  0x17   : > { %s148_s28 = sshll.u32 %s1063_s1, 4  ;;  %p578_p4 = pnand %p577_p1, %p882_p3  ;;  %s149_s28 = int_to_ptr.hbm [resolvable:$true] %s148_s28 }
  0x18   : > { %p35_p6 = scmp.ge.s32.totalorder %s33_s9, 2  ;;  %s526_s11 = sshll.u32 %s169_s10, 3 }
  0x19   : > { %580 = dma.hbm_to_smem (!%p578_p4), %s149_s28, 16, %s813_s7, [#allocation5]  }
  0x1a   : > { %583 = dma.vmem_to_smem (!%p578_p4), %s159_s5, 16, %s814_s8, [#allocation6]  }
  0x1b   : > { %s563_s18 = sshll.u32 %s807_s16, 3  ;;  %s1072_s9 = smov (%p35_p6, %s33_s9), 0 }
  0x1c   : > { %s179_s26 = scalar_lea.hbm %s1053_s0, %s563_s18  ;;  %s37_s27 = ssub.s32 %s807_s16, %s1072_s9 }
  0x1d   : > { %s180_s30 = sshll.u32 %s179_s26, 4  ;;  %p40_p5 = scmp.eq.s32.totalorder %s37_s27, 0  ;;  %s181_s30 = int_to_ptr.hbm [resolvable:$true] %s180_s30 }
  0x1e   : > { %s173_s28 = scalar_lea.vmem [#allocation2], %s526_s11  ;;  %s170_s7 = scalar_lea.sflag [#allocation3], %s169_s10 }
  0x1f   : > { %s182_s4 = sshll.u32 %s173_s28, 4  ;;  %s815_s8 = smov 32   ;;  %s183_s4 = int_to_ptr.vmem [resolvable:$true] %s182_s4 }
  0x20   : > { %s941_s5 = scalar_select %p40_p5, %s799_s14, %s42_s20  }
  0x21   : > { %s816_s1 = smov 2   ;;  %194 = sbr.rel (%p909_p12) target bundleno = 241 (0xf1), region = 32 }
  0x22   : > { %587 = dma.hbm_to_vmem [thread:$0]  (!%p922_p2), %s181_s30, 128, %s183_s4, %s170_s7, %s815_s8, %s815_s8, %s816_s1  }
  0x23   : > { %s948_s18 = sand.u32 (!%p909_p12), 1, %s795_s13  }
  0x24   : > { %s530_s11 = sshll.u32 (!%p909_p12), %s948_s18, 3  ;;  %s197_s19 = scalar_lea.sflag (!%p909_p12), [#allocation3], %s948_s18 }
  0x25   : > { %s954_s20 = scalar_lea.vmem (!%p909_p12), [#allocation2], %s530_s11 }
  0x26   : > { %774 = dma.done.wait (%p892_p7), %s197_s19, 128  }
  0x27   : > { %776 = vsyncadd (%p892_p7), %s197_s19, 4294967168 }
  0x28   : > { %778 = dma.done.wait (%p882_p3), [#allocation5], 16  }
  0x29   : > { %780 = vsyncadd (%p882_p3), [#allocation5], 4294967280 }
  0x2a   : > { %782 = dma.done.wait (%p882_p3), [#allocation6], 16  }
  0x2b   : > { %784 = vsyncadd (%p882_p3), [#allocation6], 4294967280 }
  0x2c   : > { %216 = sfence }
  0x2d   : > { %v969_v0 = vld [vmem:[%s954_s20] sm:$0x3]  ;;  %v534_v1 = vld [vmem:[%s954_s20 + $0x2] sm:$0x3]  ;;  %v535_v2 = vld [vmem:[%s954_s20 + $0x4] sm:$0x3]  ;;  %v249_v14 = vlaneseq }
  0x2e   : > { %v238_v3 = vmax.f32 %v969_v0, %v534_v1  ;;  %v239_v4 = vadd.f32 %v534_v1, %v969_v0  ;;  %v536_v5 = vld [vmem:[%s954_s20 + $0x6] sm:$0x3]  ;;  %s817_s1 = smov 2   ;;  %s818_s21 = smov 3  }
  0x2f   : > { %s819_s23 = smov 1   ;;  %s820_s29 = smov 127   ;;  %v250_v18 = vand.u32 127, %v249_v14 }
  0x30   : > { %v242_v6 = vmax.f32 %v238_v3, %v535_v2  ;;  %v243_v7 = vadd.f32 %v535_v2, %v239_v4  ;;  %s821_s6 = smov 126   ;;  %s822_s10 = smov 125  }
  0x31   : > { %s538_s22 = sld [smem:[#allocation7 + $0x1]]  ;;  %v255_v28 = vand.u32 15, %v250_v18 }
  0x32   : > { %v976_v8 = vmax.f32 %v242_v6, %v536_v5  ;;  %v247_v9 = vadd.f32 %v536_v5, %v243_v7  ;;  %s267_s26 = sld [smem:[#allocation7]] }
  0x33   : > { %s539_s27 = sld [smem:[#allocation7 + $0x8]]  ;;  %vm288_vm0 = vcmp.ge.s32.totalorder %v255_v28, 2  ;;  %vm274_vm1 = vcmp.ge.s32.totalorder %v255_v28, 3  ;;  %vm302_vm2 = vcmp.ge.s32.totalorder %v255_v28, 1  ;;  %vm324_vm3 = vcmp.lt.s32.totalorder %v255_v28, 15 }
  0x34   : > { %277 = vrot.lane.b32.xlu1 %v976_v8, %s817_s1  ;;  %263 = vrot.lane.b32.xlu0 %v976_v8, %s818_s21  ;;  %v248_v10 = vmul.f32 0.25, %v247_v9  ;;  %s537_s30 = sld [smem:[#allocation7 + $0x7]]  ;;  %vm338_vm4 = vcmp.lt.s32.totalorder %v255_v28, 14  ;;  %vm352_vm5 = vcmp.lt.s32.totalorder %v255_v28, 13  ;;  %v556_v28 = vld [vmem:[%s954_s20 + $0x6] sm:$0x3] }
  0x35   : > { %291 = vrot.lane.b32.xlu2 %v976_v8, %s819_s23  ;;  %s540_s28 = sld [smem:[#allocation7 + $0x2]] }
  0x36   : > { %s541_s4 = sld [smem:[#allocation7 + $0x9]] }
  0x37   : > { %s986_s7 = sld [smem:[#allocation7 + $0xb]]  ;;  %v282_v16 = vstv %s538_s22 }
  0x38   : > { %s988_s8 = sld [smem:[#allocation7 + $0x3]]  ;;  %v268_v17 = vstv %s267_s26 }
  0x39   : > { %s990_s19 = sld [smem:[#allocation7 + $0xa]]  ;;  %v285_v19 = vstv %s539_s27  ;;  %s564_s27 = sshll.u32 %s803_s15, 3 }
  0x3a   : > { %v271_v20 = vstv %s537_s30  ;;  %s355_s22 = sld [smem:[#allocation8]] }
  0x3b   : > { %v296_v27 = vstv %s540_s28  ;;  %s550_s26 = sld [smem:[#allocation8 + $0x1]] }
  0x3c   : > { %279 = vrot.lane.b32.xlu1 %v248_v10, %s817_s1  ;;  %265 = vrot.lane.b32.xlu0 %v248_v10, %s818_s21  ;;  %s992_s21 = sld [smem:[#allocation7 + $0x4]]  ;;  %v299_v29 = vstv %s541_s4  ;;  %s407_s4 = scalar_lea.hbm %s1056_s3, %s564_s27 }
  0x3d   : > { %293 = vrot.lane.b32.xlu2 %v248_v10, %s819_s23  ;;  %s994_s23 = sld [smem:[#allocation7 + $0x5]]  ;;  %v321_v36 = vstv %s986_s7  ;;  %s234_s7 = scalar_lea.vmem [#allocation9], %s530_s11 }
  0x3e   : > { %v306_v37 = vstv %s988_s8  ;;  %s408_s8 = sshll.u32 %s234_s7, 4  ;;  %s410_s15 = sshll.u32 %s407_s4, 4  ;;  %s409_s8 = int_to_ptr.vmem [resolvable:$true] %s408_s8  ;;  %s411_s15 = int_to_ptr.hbm [resolvable:$true] %s410_s15 }
  0x3f   : > { %v309_v35 = vstv %s990_s19  ;;  %v307_v46 = vmul.f32 %v306_v37, %v976_v8  ;;  %s395_s19 = scalar_lea.sflag [#allocation4], %s948_s18 }
  0x40   : > { %v310_v42 = vmul.f32 %v309_v35, %v248_v10  ;;  %v356_v9 = vstv %s355_s22 }
  0x42   : > { %v318_v38 = vstv %s992_s21  ;;  %v311_v52 = vadd.f32 %v310_v42, %v307_v46  ;;  %s735_s21 = sshra.s32 %s411_s15, 4  ;;  %s736_s21 = int_to_ptr.hbm [resolvable:$true] %s735_s21 }
  0x43   : > { %v332_v55 = vstv %s994_s23  ;;  %p742_p11 = scmp.lt.s32.totalorder %s736_s21, %s1056_s3 }
  0x44   : > { %315 = vrot.lane.b32.xlu1 %v248_v10, %s820_s29  ;;  %313 = vrot.lane.b32.xlu0 %v976_v8, %s820_s29  ;;  %s996_s29 = sld [smem:[#allocation7 + $0xd]] }
  0x45   : > { %327 = vrot.lane.b32.xlu2 %v976_v8, %s821_s6 }
  0x4a   : > { %v349_v49 = vstv %s996_s29  ;;  %s741_s29 = scalar_lea.hbm %s1056_s3, 16 }
  0x4c   : > { %329 = vrot.lane.b32.xlu0 %v248_v10, %s821_s6  ;;  %341 = vrot.lane.b32.xlu1 %v976_v8, %s822_s10  ;;  %s999_s6 = sld [smem:[#allocation7 + $0xc]] }
  0x4d   : > { %343 = vrot.lane.b32.xlu2 %v248_v10, %s822_s10  ;;  %s548_s10 = sld [smem:[#allocation7 + $0x6]] }
  0x52   : > { %v335_v56 = vstv %s999_s6 }
  0x53   : > { %v346_v57 = vstv %s548_s10 }
  0x8f   : > { %v292_v11 = vpop.permute.xlu2 %291 }
  0x90   : > { %v297_v33 = vmul.f32 %v296_v27, %v292_v11  ;;  %v359_v11 = vstv %s550_s26 }
  0x97   : > { %v294_v15 = vpop.permute.xlu2 %293 }
  0x98   : > { %v300_v34 = vmul.f32 %v299_v29, %v294_v15 }
  0x9a   : > { %v301_v44 = vadd.f32 %v300_v34, %v297_v33 }
  0x9c   : > { %v303_v51 = vsel %vm302_vm2, %v301_v44, 0.0 }
  0x9f   : > { %v328_v30 = vpop.permute.xlu2 %327 }
  0xa0   : > { %v333_v62 = vmul.f32 %v332_v55, %v328_v30 }
  0xa6   : > { %v278_v12 = vpop.permute.xlu1 %277  ;;  %v264_v13 = vpop.permute.xlu0 %263 }
  0xa7   : > { %v283_v23 = vmul.f32 %v282_v16, %v278_v12  ;;  %v269_v24 = vmul.f32 %v268_v17, %v264_v13  ;;  %v344_v50 = vpop.permute.xlu2 %343 }
  0xa8   : > { %v350_v58 = vmul.f32 %v349_v49, %v344_v50 }
  0xae   : > { %v280_v21 = vpop.permute.xlu1 %279  ;;  %v266_v22 = vpop.permute.xlu0 %265 }
  0xaf   : > { %v286_v25 = vmul.f32 %v285_v19, %v280_v21  ;;  %v272_v26 = vmul.f32 %v271_v20, %v266_v22 }
  0xb1   : > { %v287_v31 = vadd.f32 %v286_v25, %v283_v23  ;;  %v273_v32 = vadd.f32 %v272_v26, %v269_v24  ;;  %v552_v25 = vld [vmem:[%s954_s20 + $0x2] sm:$0x3]  ;;  %v554_v26 = vld [vmem:[%s954_s20 + $0x4] sm:$0x3]  ;;  %s737_s20 = scalar_lea.hbm %s736_s21, 8 }
  0xb2   : > { %p738_p3 = scmp.ne.s32.totalorder %s736_s21, %s737_s20  ;;  %p743_p12 = scmp.lt.s32.totalorder %s741_s29, %s737_s20 }
  0xb3   : > { %v289_v39 = vsel %vm288_vm0, %v287_v31, 0.0  ;;  %v275_v40 = vsel %vm274_vm1, %v273_v32, 0.0 }
  0xb4   : > { %v290_v48 = vadd.f32 %v289_v39, %v275_v40  ;;  %p739_p7 = pnand %p738_p3, %p896_p8  ;;  %p744_p0 = por %p743_p12, %p742_p11 }
  0xb6   : > { %v316_v41 = vpop.permute.xlu1 %315  ;;  %v314_v43 = vpop.permute.xlu0 %313  ;;  %v304_v54 = vadd.f32 %v303_v51, %v290_v48  ;;  %p740_p10 = pneg %p739_p7 }
  0xb7   : > { %v322_v45 = vmul.f32 %v321_v36, %v316_v41  ;;  %v319_v47 = vmul.f32 %v318_v38, %v314_v43 }
  0xb8   : > { %v312_v2 = vadd.f32 %v311_v52, %v304_v54  ;;  %p745_p1 = pnand %p744_p0, %p740_p10 }
  0xb9   : > { %v323_v53 = vadd.f32 %v322_v45, %v319_v47 }
  0xbb   : > { %v325_v61 = vsel %vm324_vm3, %v323_v53, 0.0 }
  0xbc   : > { %v326_v5 = vadd.f32 %v325_v61, %v312_v2 }
  0xbe   : > { %v330_v59 = vpop.permute.xlu0 %329  ;;  %v342_v60 = vpop.permute.xlu1 %341 }
  0xbf   : > { %v336_v63 = vmul.f32 %v335_v56, %v330_v59  ;;  %v347_v1 = vmul.f32 %v346_v57, %v342_v60 }
  0xc1   : > { %v337_v3 = vadd.f32 %v336_v63, %v333_v62  ;;  %v351_v4 = vadd.f32 %v350_v58, %v347_v1 }
  0xc3   : > { %v339_v6 = vsel %vm338_vm4, %v337_v3, 0.0  ;;  %v353_v7 = vsel %vm352_vm5, %v351_v4, 0.0 }
  0xc4   : > { %v340_v8 = vadd.f32 %v339_v6, %v326_v5 }
  0xc6   : > { %v354_v10 = vadd.f32 %v353_v7, %v340_v8 }
  0xc8   : > { %v357_v12 = vmul.f32 %v356_v9, %v354_v10 }
  0xca   : > { %v360_v13 = vadd.f32 %v359_v11, %v357_v12 }
  0xcc   : > { %v551_v14 = vmul.f32 -1.442695, %v360_v13 }
  0xce   : > { %657 = vpow2.f32 %v551_v14 }
  0xd4   : > { %v658_v15 = vpop.eup %657 }
  0xd5   : > { %v364_v16 = vadd.f32 1.0, %v658_v15 }
  0xd7   : > { %659 = vrcp.f32 %v364_v16  ;;  %v376_v20 = vand.u32 2147483648, %v364_v16  ;;  %v374_v22 = vand.u32 2147483647, %v364_v16  ;;  %vm370_vm7 = vweird.f32 %v364_v16 }
  0xd9   : > { %v377_v24 = vor.u32 1.1754944e-38, %v376_v20  ;;  %vm375_vm9 = vcmp.eq.f32.partialorder %v374_v22, 8.507059e+37 }
  0xdd   : > { %v660_v17 = vpop.eup %659 }
  0xde   : > { %v366_v18 = vmul.f32 %v660_v17, %v364_v16  ;;  %vm371_vm6 = vweird.f32 %v660_v17 }
  0xdf   : > { %vm372_vm8 = vmor %vm370_vm7, %vm371_vm6 }
  0xe0   : > { %v367_v19 = vsub.f32 1.0, %v366_v18 }
  0xe2   : > { %v368_v21 = vmul.f32 %v660_v17, %v367_v19 }
  0xe4   : > { %v369_v23 = vadd.f32 %v660_v17, %v368_v21 }
  0xe6   : > { %v373_v27 = vsel %vm372_vm8, %v660_v17, %v369_v23 }
  0xe7   : > { %v378_v29 = vsel %vm375_vm9, %v377_v24, %v373_v27 }
  0xe8   : > { %v380_v30 = vmul.f32 %v378_v29, %v969_v0  ;;  %v383_v31 = vmul.f32 %v552_v25, %v378_v29  ;;  %v387_v32 = vmul.f32 %v554_v26, %v378_v29  ;;  %v391_v33 = vmul.f32 %v556_v28, %v378_v29 }
  0xea   : > { %381 = vst [vmem:[%s234_s7] sm:$0x3] %v380_v30 }
  0xeb   : > { %553 = vst [vmem:[%s234_s7 + $0x2] sm:$0x3] %v383_v31 }
  0xec   : > { %555 = vst [vmem:[%s234_s7 + $0x4] sm:$0x3] %v387_v32 }
  0xed   : > { %557 = vst [vmem:[%s234_s7 + $0x6] sm:$0x3] %v391_v33 }
  0xee   : > { %748 = shalt.err (!%p745_p1)
}
  0xef   : > { %s823_s18 = smov 32  }
  0xf0   : > { %575 = dma.vmem_to_hbm [thread:$0]  (%p896_p8), %s409_s8, 128, %s411_s15, %s395_s19, %s823_s18, %s823_s18, %s817_s1  }
  0xf1 PF: > { %s425_s22 = sand.u32 1, %s791_s12   ;;  %p589_p2 = pnand %p525_p13, %p900_p9 }
  0xf2   : > { %s426_s26 = scalar_lea.sflag [#allocation4], %s425_s22 }
  0xf3   : > { %p590_p4 = pneg %p589_p2 }
  0xf5   : > { %786 = dma.done.wait (%p590_p4), %s426_s26, 128  }
  0xf6   : > { %788 = vsyncadd (%p590_p4), %s426_s26, 4294967168  ;;  %s21_s17 = sadd.s32 1, %s811_s17   ;;  %s1066_s12 = smov %s795_s13 }
  0xf7   : > { %p18_p6 = scmp.ge.s32.totalorder %s21_s17, 4   ;;  %s1067_s13 = smov %s799_s14 }
  0xf8   : > { %s1068_s14 = smov %s941_s5  ;;  %s1069_s15 = smov %s807_s16 }
  0xf9   : > { %s1070_s16 = smov %s1072_s9  ;;  %20 = sbr.rel (!%p18_p6) target bundleno = 10 (0xa), region = 93 }
  0xfe   :  { %432 = vsyncpa [#allocation3], 1 }
  0xff   :  { %434 = vsyncpa [#allocation3 + $0x1], 1 }
 0x100   :  { %435 = vsyncpa [#allocation4], 1 }
 0x101   :  { %437 = vsyncpa [#allocation4 + $0x1], 1 }
 0x102   :  { %438 = vsyncpa [#allocation5], 1 }
 0x103   :  { %440 = vsyncpa [#allocation5 + $0x1], 1 }
 0x104   :  { %441 = vsyncpa [#allocation6], 1 }
 0x105   :  { %443 = vsyncpa [#allocation6 + $0x1], 1 }

</bundles_post_ra>
